<compile_context>
chip_gen: v7x
topology: tpu7x:2x2x1
jax: 0.10.0
libtpu: 0.0.40
codegen_flags: <defaults>
</compile_context>

<pallas_src>
import math
from functools import partial

import jax
import jax.numpy as jnp
from jax.experimental import pallas as pl
from jax.experimental.pallas import tpu as pltpu


def _cdiv(a, b):
    return -(-a // b)


def _se_gate_kernel(x_ref, w1_ref, b1_ref, w2_ref, b2_ref, o_ref):
    # x_ref : (block_rows, D)  packed input rows (pack logical rows per slab)
    # w1_ref: (D, H)           block-diagonal W1^T   (D = pack*dim, H = pack*hidden)
    # b1_ref: (1, H)
    # w2_ref: (H, D)           block-diagonal W2^T
    # b2_ref: (1, D)
    x = x_ref[...].astype(jnp.float32)
    h = jnp.dot(x, w1_ref[...].astype(jnp.float32),
                preferred_element_type=jnp.float32)
    h = jnp.maximum(h + b1_ref[...].astype(jnp.float32), 0.0)        # ReLU
    y = jnp.dot(h, w2_ref[...].astype(jnp.float32),
                preferred_element_type=jnp.float32)
    y = y + b2_ref[...].astype(jnp.float32)
    o_ref[...] = jax.nn.sigmoid(y).astype(o_ref.dtype)               # Sigmoid


@partial(jax.jit, static_argnames=("block_rows",))
def attention_layer(x, w1_t, b1, w2_t, b2, *, block_rows=2048):
    """x: (..., dim) -> (..., dim, 1), matching Attentionlayer.forward."""
    orig_shape = x.shape
    dim = orig_shape[-1]
    hidden = w1_t.shape[-1]
    M = math.prod(orig_shape[:-1]) if len(orig_shape) > 1 else 1

    # --- lane packing: fold `pack` logical rows into one 128-lane slab -------
    if dim < 128 and 128 % dim == 0:
        pack = 128 // dim
    else:
        pack = 1                       # dim already wide; keep as-is
    D = pack * dim
    H = pack * hidden

    rows = _cdiv(M, pack)              # packed rows
    row_align = 16                     # sublane-safe for f32 and bf16
    block_rows = max(row_align,
                     min(block_rows, _cdiv(rows, row_align) * row_align))
    rows_pad = _cdiv(rows, block_rows) * block_rows
    m_pad = rows_pad * pack

    x2d = x.reshape(M, dim)
    if m_pad != M:
        x2d = jnp.pad(x2d, ((0, m_pad - M), (0, 0)))
    xp = x2d.reshape(rows_pad, D)      # contiguous reshape: free (no copy)

    # Block-diagonal weights (kron with identity) + tiled biases.
    w1_bd = jnp.kron(jnp.eye(pack, dtype=w1_t.dtype), w1_t)   # (D, H)
    w2_bd = jnp.kron(jnp.eye(pack, dtype=w2_t.dtype), w2_t)   # (H, D)
    b1_p = jnp.tile(b1.reshape(1, hidden), (1, pack))          # (1, H)
    b2_p = jnp.tile(b2.reshape(1, dim), (1, pack))             # (1, D)

    itemsize = jnp.dtype(x.dtype).itemsize
    cost = pl.CostEstimate(
        flops=4 * M * dim * max(hidden, 1),
        transcendentals=M * dim,
        bytes_accessed=2 * M * dim * itemsize
        + (2 * dim * hidden + dim + hidden) * 4,
    )

    grid = (rows_pad // block_rows,)
    out = pl.pallas_call(
        _se_gate_kernel,
        out_shape=jax.ShapeDtypeStruct((rows_pad, D), x.dtype),
        grid_spec=pltpu.PrefetchScalarGridSpec(
            num_scalar_prefetch=0,
            grid=grid,
            in_specs=[
                pl.BlockSpec((block_rows, D), lambda i: (i, 0)),  # x tile
                pl.BlockSpec((D, H), lambda i: (0, 0)),           # W1 block-diag
                pl.BlockSpec((1, H), lambda i: (0, 0)),           # b1
                pl.BlockSpec((H, D), lambda i: (0, 0)),           # W2 block-diag
                pl.BlockSpec((1, D), lambda i: (0, 0)),           # b2
            ],
            out_specs=pl.BlockSpec((block_rows, D), lambda i: (i, 0)),
        ),
        compiler_params=pltpu.CompilerParams(
            dimension_semantics=("parallel",),
        ),
        cost_estimate=cost,
    )(xp, w1_bd, b1_p, w2_bd, b2_p)

    att = out.reshape(m_pad, dim)[:M].reshape(*orig_shape, 1)
    return att


def init_params(key, dim, r=16, dtype=jnp.float32):
    """Deterministic parameter init (same shapes as the nn.Module)."""
    hidden = max(1, int(dim // r))     # guard: dim < r would give 0-width layer
    k1, k2, k3, k4 = jax.random.split(key, 4)
    # torch.nn.Linear: weight (out, in), bias (out,). We store transposed
    # weights (in, out) so the kernel computes x @ W^T directly.
    bound1 = 1.0 / (dim ** 0.5)
    w1 = jax.random.uniform(k1, (hidden, dim), dtype, -bound1, bound1)
    b1 = jax.random.uniform(k2, (hidden,), dtype, -bound1, bound1)
    bound2 = 1.0 / (hidden ** 0.5)
    w2 = jax.random.uniform(k3, (dim, hidden), dtype, -bound2, bound2)
    b2 = jax.random.uniform(k4, (dim,), dtype, -bound2, bound2)
    return w1.T, b1, w2.T, b2  # (dim,hidden), (hidden,), (hidden,dim), (dim,)


if __name__ == "__main__":
    key = jax.random.PRNGKey(0)
    kx, kp = jax.random.split(key)

    B, N, dim, r = 2, 8, 32, 16          # hidden = dim // r = 2
    x = jax.random.normal(kx, (B, N, dim), jnp.float32)
    w1_t, b1, w2_t, b2 = init_params(kp, dim, r)

    att = attention_layer(x, w1_t, b1, w2_t, b2)
    att = jax.block_until_ready(att)

    # Reference check against plain JAX (same math as the PyTorch module).
    ref = jax.nn.sigmoid(
        jnp.maximum(x @ w1_t + b1, 0.0) @ w2_t + b2
    )[..., None]
    assert att.shape == (B, N, dim, 1)
    assert jnp.allclose(att, ref, atol=1e-5, rtol=1e-5)

    print("KERNEL_OK")
</pallas_src>

<mosaic_0001>
module attributes {stable_mosaic.version = 11 : i64} {
  func.func @_se_gate_kernel(%arg0: i32, %arg1: memref<16x128xf32, #tpu.memory_space<vmem>>, %arg2: memref<128x8xf32, #tpu.memory_space<vmem>>, %arg3: memref<1x8xf32, #tpu.memory_space<vmem>>, %arg4: memref<8x128xf32, #tpu.memory_space<vmem>>, %arg5: memref<1x128xf32, #tpu.memory_space<vmem>>, %arg6: memref<16x128xf32, #tpu.memory_space<vmem>>) attributes {dimension_semantics = [#tpu.dimension_semantics<parallel>], iteration_bounds = array<i64: 1>, scalar_prefetch = 0 : i64, scratch_operands = 0 : i64, tpu.core_type = #tpu.core_type<tc>, window_params = [{transform_indices = @transform_0, window_bounds = array<i64: 16, 128>}, {pipeline_mode = #tpu.pipeline_mode<synchronous>, transform_indices = @transform_1, window_bounds = array<i64: 128, 8>}, {pipeline_mode = #tpu.pipeline_mode<synchronous>, transform_indices = @transform_2, window_bounds = array<i64: 1, 8>}, {pipeline_mode = #tpu.pipeline_mode<synchronous>, transform_indices = @transform_3, window_bounds = array<i64: 8, 128>}, {pipeline_mode = #tpu.pipeline_mode<synchronous>, transform_indices = @transform_4, window_bounds = array<i64: 1, 128>}, {transform_indices = @transform_5, window_bounds = array<i64: 16, 128>}]} {
    %c0 = arith.constant 0 : index
    %c0_0 = arith.constant 0 : index
    %0 = vector.load %arg1[%c0, %c0_0] : memref<16x128xf32, #tpu.memory_space<vmem>>, vector<16x128xf32>
    %c0_1 = arith.constant 0 : index
    %c0_2 = arith.constant 0 : index
    %1 = vector.load %arg2[%c0_1, %c0_2] : memref<128x8xf32, #tpu.memory_space<vmem>>, vector<128x8xf32>
    %cst = arith.constant dense<0.000000e+00> : vector<16x8xf32>
    %2 = tpu.matmul %0, %1, %cst {dimension_numbers = #tpu.dot_dimension_numbers<[1], [0], [0], [1], [0, 0, 1, 1], [], []>} : vector<16x128xf32>, vector<128x8xf32>, vector<16x8xf32> -> vector<16x8xf32>
    %c0_3 = arith.constant 0 : index
    %c0_4 = arith.constant 0 : index
    %3 = vector.load %arg3[%c0_3, %c0_4] : memref<1x8xf32, #tpu.memory_space<vmem>>, vector<1x8xf32>
    %4 = vector.broadcast %3 : vector<1x8xf32> to vector<16x8xf32>
    %5 = arith.addf %2, %4 : vector<16x8xf32>
    %cst_5 = arith.constant 0.000000e+00 : f32
    %6 = vector.broadcast %cst_5 : f32 to vector<16x8xf32>
    %7 = arith.maximumf %5, %6 : vector<16x8xf32>
    %c0_6 = arith.constant 0 : index
    %c0_7 = arith.constant 0 : index
    %8 = vector.load %arg4[%c0_6, %c0_7] : memref<8x128xf32, #tpu.memory_space<vmem>>, vector<8x128xf32>
    %cst_8 = arith.constant dense<0.000000e+00> : vector<16x128xf32>
    %9 = tpu.matmul %7, %8, %cst_8 {dimension_numbers = #tpu.dot_dimension_numbers<[1], [0], [0], [1], [0, 0, 1, 1], [], []>} : vector<16x8xf32>, vector<8x128xf32>, vector<16x128xf32> -> vector<16x128xf32>
    %c0_9 = arith.constant 0 : index
    %c0_10 = arith.constant 0 : index
    %10 = vector.load %arg5[%c0_9, %c0_10] : memref<1x128xf32, #tpu.memory_space<vmem>>, vector<1x128xf32>
    %11 = vector.broadcast %10 : vector<1x128xf32> to vector<16x128xf32>
    %12 = arith.addf %9, %11 : vector<16x128xf32>
    %13 = arith.negf %12 : vector<16x128xf32>
    %14 = math.exp %13 : vector<16x128xf32>
    %cst_11 = arith.constant 1.000000e+00 : f32
    %15 = vector.broadcast %cst_11 : f32 to vector<16x128xf32>
    %16 = arith.addf %15, %14 : vector<16x128xf32>
    %17 = arith.divf %15, %16 : vector<16x128xf32>
    %c0_12 = arith.constant 0 : index
    %c0_13 = arith.constant 0 : index
    %18 = vector.load %arg6[%c0_12, %c0_13] : memref<16x128xf32, #tpu.memory_space<vmem>>, vector<16x128xf32>
    tpu.vector_store %arg6[%c0_12, %c0_13], %17 {strides = array<i32>} : memref<16x128xf32, #tpu.memory_space<vmem>>, vector<16x128xf32>,
    return
  }
  func.func @transform_0(%arg0: i32) -> (i32, i32) {
    %c0_i32 = arith.constant 0 : i32
    %c0_i32_0 = arith.constant 0 : i32
    return %arg0, %c0_i32 : i32, i32
  }
  func.func @transform_1(%arg0: i32) -> (i32, i32) {
    %c0_i32 = arith.constant 0 : i32
    %c0_i32_0 = arith.constant 0 : i32
    %c0_i32_1 = arith.constant 0 : i32
    return %c0_i32, %c0_i32_0 : i32, i32
  }
  func.func @transform_2(%arg0: i32) -> (i32, i32) {
    %c0_i32 = arith.constant 0 : i32
    %c0_i32_0 = arith.constant 0 : i32
    %c0_i32_1 = arith.constant 0 : i32
    return %c0_i32, %c0_i32_0 : i32, i32
  }
  func.func @transform_3(%arg0: i32) -> (i32, i32) {
    %c0_i32 = arith.constant 0 : i32
    %c0_i32_0 = arith.constant 0 : i32
    %c0_i32_1 = arith.constant 0 : i32
    return %c0_i32, %c0_i32_0 : i32, i32
  }
  func.func @transform_4(%arg0: i32) -> (i32, i32) {
    %c0_i32 = arith.constant 0 : i32
    %c0_i32_0 = arith.constant 0 : i32
    %c0_i32_1 = arith.constant 0 : i32
    return %c0_i32, %c0_i32_0 : i32, i32
  }
  func.func @transform_5(%arg0: i32) -> (i32, i32) {
    %c0_i32 = arith.constant 0 : i32
    %c0_i32_0 = arith.constant 0 : i32
    return %arg0, %c0_i32 : i32, i32
  }
}

</mosaic_0001>

<bundles_post_ra>
// kernel: attention_layer.1
= control target key start
LH: loop header
LB: loop body
LE: loop exit
PB: predicated region body
PF: predicated region fallthrough
CT: control target
= control target key end

     0   :  { %vm130_vm0 = vcmask 64512   ;;  %s436_s1 = inlined_call_operand.vmem [shape: f32[128,8], index: 1, kind: input, shape index: {}]   ;;  %s437_s0 = inlined_call_operand.vmem [shape: f32[16,128], index: 0, kind: input, shape index: {}]   ;;  %s438_s3 = inlined_call_operand.vmem [shape: f32[8,128], index: 3, kind: input, shape index: {}]   ;;  %s439_s2 = inlined_call_operand.vmem [shape: f32[1,8], index: 2, kind: input, shape index: {}]   ;;  %s440_s4 = inlined_call_operand.vmem [shape: f32[1,128], index: 4, kind: input, shape index: {}]   ;;  %s441_s5 = inlined_call_operand.vmem [shape: f32[16,128], index: 5, kind: output, shape index: {}]  }
   0x1   :  { %v22_v0 = vld [vmem:[%s436_s1] sm:$0xff]  ;;  %v23_v1 = vld [vmem:[%s436_s1 + $0x8] sm:$0xff]  ;;  %v24_v2 = vld [vmem:[%s436_s1 + $0x10] sm:$0xff] }
   0x2   :  { %v297_v3 = vpack.c.bf16 %v23_v1, %v22_v0  ;;  %v25_v4 = vld [vmem:[%s436_s1 + $0x18] sm:$0xff]  ;;  %v26_v6 = vld [vmem:[%s436_s1 + $0x20] sm:$0xff]  ;;  %v27_v7 = vld [vmem:[%s436_s1 + $0x28] sm:$0xff] }
   0x3   :  { %v301_v5 = vpack.c.bf16 %v25_v4, %v24_v2  ;;  %v305_v8 = vpack.c.bf16 %v27_v7, %v26_v6  ;;  %v20_v9 = vld [vmem:[%s437_s0] sm:$0xff]  ;;  %v28_v10 = vld [vmem:[%s436_s1 + $0x30] sm:$0xff]  ;;  %v29_v11 = vld [vmem:[%s436_s1 + $0x38] sm:$0xff] }
   0x4   :  { %298 = vmatprep.subr.bf16.mxu0 %v297_v3  ;;  %289 = vmatprep.mubr.f32.mxu0 %v20_v9  ;;  %v309_v12 = vpack.c.bf16 %v29_v11, %v28_v10  ;;  %v30_v13 = vld [vmem:[%s436_s1 + $0x40] sm:$0xff]  ;;  %v31_v14 = vld [vmem:[%s436_s1 + $0x48] sm:$0xff]  ;;  %v32_v16 = vld [vmem:[%s436_s1 + $0x50] sm:$0xff] }
   0x5   :  { %300 = vmatpush3.bf16.msra.mxu0 %v297_v3  ;;  %v313_v15 = vpack.c.bf16 %v31_v14, %v30_v13  ;;  %v33_v17 = vld [vmem:[%s436_s1 + $0x58] sm:$0xff]  ;;  %v34_v19 = vld [vmem:[%s436_s1 + $0x60] sm:$0xff]  ;;  %v35_v20 = vld [vmem:[%s436_s1 + $0x68] sm:$0xff] }
   0x6   :  { %302 = vmatprep.subr.bf16.mxu0 %v301_v5  ;;  %v317_v18 = vpack.c.bf16 %v33_v17, %v32_v16  ;;  %v321_v21 = vpack.c.bf16 %v35_v20, %v34_v19  ;;  %v36_v22 = vld [vmem:[%s436_s1 + $0x70] sm:$0xff]  ;;  %v37_v23 = vld [vmem:[%s436_s1 + $0x78] sm:$0xff]  ;;  %v21_v25 = vld [vmem:[%s437_s0 + $0x8] sm:$0xff] }
   0x7   :  { %v325_v24 = vpack.c.bf16 %v37_v23, %v36_v22  ;;  %v122_v26 = vld [vmem:[%s438_s3] sm:$0xff] }
   0x8   :  { %292 = vmatprep.subr.mxu1 %v122_v26  ;;  %v230_v27 = vld [vmem:[%s439_s2] ss:$0 sm:$0xff] }
   0x9   :  { %304 = vmatpush3.bf16.msra.mxu0 %v301_v5  ;;  %293 = vmatpush3.msra.mxu1 %v122_v26  ;;  %v231_v34 = vld [vmem:[%s440_s4] ss:$0 sm:$0xff] }
   0xa   :  { %306 = vmatprep.subr.bf16.mxu0 %v305_v8 }
   0xd   :  { %308 = vmatpush3.bf16.msra.mxu0 %v305_v8 }
   0xe   :  { %310 = vmatprep.subr.bf16.mxu0 %v309_v12 }
  0x11   :  { %312 = vmatpush3.bf16.msra.mxu0 %v309_v12 }
  0x12   :  { %314 = vmatprep.subr.bf16.mxu0 %v313_v15 }
  0x15   :  { %316 = vmatpush3.bf16.msra.mxu0 %v313_v15 }
  0x16   :  { %318 = vmatprep.subr.bf16.mxu0 %v317_v18 }
  0x19   :  { %320 = vmatpush3.bf16.msra.mxu0 %v317_v18 }
  0x1a   :  { %322 = vmatprep.subr.bf16.mxu0 %v321_v21 }
  0x1d   :  { %324 = vmatpush3.bf16.msra.mxu0 %v321_v21 }
  0x1e   :  { %326 = vmatprep.subr.bf16.mxu0 %v325_v24 }
  0x21   :  { %328 = vmatpush3.bf16.msra.mxu0 %v325_v24 }
  0x24   :  { %290 = vmatmul.mubr.f32.vlgmr.msra.gmra.mrb[0].mxu0 %v21_v25 }
  0xf7   :  { %v291_v28 = vpop.f32.mrb[0].mxu0 }
  0xf8   :  { %v117_v29 = vadd.f32 %v291_v28, %v230_v27  ;;  %v111_v30 = vpop.f32.mrb[1].mxu0 }
  0xf9   :  { %v112_v31 = vadd.f32 %v230_v27, %v111_v30 }
  0xfa   :  { %v121_v33 = vmax.f32 %v117_v29, 0.0 }
  0xfb   :  { %v120_v32 = vmax.f32 %v112_v31, 0.0 }
  0xfd   :  { %294 = vmatprep.mubr.msk.f32.mxu1 %vm130_vm0, %v120_v32 }
  0xfe   :  { %295 = vmatmul.mubr.msk.f32.vlgmr.msra.gmra.mrb[0].mxu1 %vm130_vm0, %v121_v33 }
 0x1d1   :  { %v296_v35 = vpop.f32.mrb[0].mxu1 }
 0x1d2   :  { %v209_v36 = vadd.f32 %v296_v35, %v231_v34  ;;  %v203_v37 = vpop.f32.mrb[1].mxu1 }
 0x1d3   :  { %v204_v38 = vadd.f32 %v231_v34, %v203_v37 }
 0x1d4   :  { %v235_v39 = vmul.f32 -1.442695, %v209_v36 }
 0x1d5   :  { %v234_v40 = vmul.f32 -1.442695, %v204_v38 }
 0x1d6   :  { %329 = vpow2.f32 %v235_v39 }
 0x1d7   :  { %331 = vpow2.f32 %v234_v40 }
 0x1e0   :  { %v330_v41 = vpop.eup %329 }
 0x1e1   :  { %v332_v42 = vpop.eup %331  ;;  %v219_v43 = vadd.f32 1.0, %v330_v41 }
 0x1e2   :  { %v218_v44 = vadd.f32 1.0, %v332_v42 }
 0x1e3   :  { %333 = vrcp.f32 %v219_v43 }
 0x1e4   :  { %335 = vrcp.f32 %v218_v44 }
 0x1ed   :  { %v334_v45 = vpop.eup %333 }
 0x1ee   :  { %v336_v46 = vpop.eup %335  ;;  %225 = vst [vmem:[%s441_s5 + $0x8] sm:$0xff] %v334_v45 }
 0x1ef   :  { %224 = vst [vmem:[%s441_s5] sm:$0xff] %v336_v46 }

</bundles_post_ra>
